<compile_context>
chip_gen: v6e
topology: v6e:2x2x1
jax: 0.10.0
libtpu: 0.0.40
codegen_flags: <defaults>
</compile_context>

<pallas_src>
import functools

import jax
import jax.numpy as jnp
from jax import lax
from jax.experimental import pallas as pl
from jax.experimental.pallas import tpu as pltpu

_LANES = 128


def _round_up(x, m):
    return ((x + m - 1) // m) * m


def _chip_config():
    """Best-effort device-aware tiling knobs (safe, correct defaults if unknown)."""
    try:
        kind = jax.devices()[0].device_kind.lower()
    except Exception:
        kind = ""
    if "v7" in kind or "7x" in kind:
        # 2 TensorCores, 64 MiB physical VMEM, ~3.2 TB/s HBM.
        return dict(num_splits=2, tile_rows_max=4096, vmem_limit=32 << 20,
                    bf16_valu=True)
    if "v6" in kind:
        # 1 TensorCore, 128 MiB VMEM, ~1.4 TB/s HBM.
        return dict(num_splits=1, tile_rows_max=8192, vmem_limit=64 << 20,
                    bf16_valu=True)
    if "v5" in kind and ("lite" in kind or "v5e" in kind):
        # v5e: 1 TensorCore; scoped-VMEM default is only 16 MiB -> keep 32 explicit.
        return dict(num_splits=1, tile_rows_max=4096, vmem_limit=32 << 20,
                    bf16_valu=False)
    # Unknown / other chips: conservative but correct everywhere.
    return dict(num_splits=2, tile_rows_max=2048, vmem_limit=32 << 20,
                bf16_valu=False)


# ----------------------------- Pallas kernel ------------------------------ #

def _isolated_triplet_loss_kernel(
    real_ref, fake_ref, mean_ref, logvar_ref, a_ref, p_ref, n_ref,
    partial_ref, latent_ref, *,
    tile_rows, tiles_per_split, valid_rows, full_blocks, needs_mask,
    diff_in_input_dtype, triplet_margin,
):
    c = pl.program_id(0)
    i = pl.program_id(1)

    # Per-core per-lane accumulator lives directly in the resident output block.
    @pl.when(i == 0)
    def _init():
        partial_ref[...] = jnp.zeros_like(partial_ref)

    # ---- hot loop: per-lane partial sum of squared error (VPU-only adds) ----
    if diff_in_input_dtype:
        # bf16 VALU available: subtract in bf16, cast only the diff.
        d = (fake_ref[...] - real_ref[...]).astype(jnp.float32)
    else:
        d = fake_ref[...].astype(jnp.float32) - real_ref[...].astype(jnp.float32)
    sq = d * d

    # TODO(synk): verify in the Mosaic dump that this reshape+reduce fuses with
    # the elementwise producer; if it materializes, rewrite as a lax.fori_loop
    # over (8,128) chunks accumulating into partial_ref.
    def _accumulate(vals):
        partial_ref[...] += jnp.sum(
            vals.reshape(tile_rows // 8, 8, _LANES), axis=0)

    if needs_mask:
        blk = c * tiles_per_split + i
        is_interior = blk < full_blocks

        @pl.when(is_interior)
        def _fast():
            _accumulate(sq)

        @pl.when(jnp.logical_not(is_interior))
        def _edge():
            # Boundary / over-covered tile: zero rows past the valid extent.
            row = lax.broadcasted_iota(jnp.int32, sq.shape, 0)
            g_row = blk * tile_rows + row
            _accumulate(jnp.where(g_row < valid_rows, sq, 0.0))
    else:
        _accumulate(sq)

    # ---- finalize (tiny terms) : run exactly once, on split 0's last step ----
    @pl.when((i == pl.num_programs(1) - 1) & (c == 0))
    def _finalize():
        # KL: -0.5 * mean(1 + logvar - mean^2 - exp(logvar)); layout [latent, B].
        mu = mean_ref[...].astype(jnp.float32)
        lv = logvar_ref[...].astype(jnp.float32)
        kl_terms = 1.0 + lv - mu * mu - jnp.exp(lv)
        kl = -0.5 * (jnp.sum(kl_terms, keepdims=True) / float(kl_terms.size))  # (1,1)

        # Triplet margin loss (F.triplet_margin_loss defaults: p=2, eps=1e-6,
        # relu, mean). Latents are [sim_dim, B]: reduce over axis 0 (sublanes).
        a = a_ref[...].astype(jnp.float32)
        p = p_ref[...].astype(jnp.float32)
        n = n_ref[...].astype(jnp.float32)
        eps = 1e-6
        batch = float(a.shape[1])
        d_ap = jnp.sqrt(jnp.sum((a - p + eps) ** 2, axis=0, keepdims=True))   # (1,B)
        d_an = jnp.sqrt(jnp.sum((a - n + eps) ** 2, axis=0, keepdims=True))   # (1,B)
        trip_vals = jnp.maximum(d_ap - d_an + triplet_margin, 0.0)
        trip = jnp.sum(trip_vals, keepdims=True) / batch                      # (1,1)

        # Triplet percentage (plain norms, no eps).
        d_ap0 = jnp.sqrt(jnp.sum((a - p) ** 2, axis=0, keepdims=True))
        d_an0 = jnp.sqrt(jnp.sum((a - n) ** 2, axis=0, keepdims=True))
        pct = jnp.sum((d_ap0 < d_an0).astype(jnp.float32), keepdims=True) / batch

        # Pack [trip, kl, pct] into lanes 0..2 of row 0 of the (8,128) block.
        sub = lax.broadcasted_iota(jnp.int32, latent_ref.shape, 0)
        lane = lax.broadcasted_iota(jnp.int32, latent_ref.shape, 1)
        row0 = sub == 0
        latent_ref[...] = (
            jnp.where(row0 & (lane == 0), trip, 0.0)
            + jnp.where(row0 & (lane == 1), kl, 0.0)
            + jnp.where(row0 & (lane == 2), pct, 0.0)
        )


# ------------------------------ JAX wrapper -------------------------------- #

def isolated_triplet_loss(
    real_data, fake_data, mean, logvar, triplet_data,
    *, kl_beta=1.0, triplet_beta=1.0, triplet_margin=1.0,
    similarity_dim=2, recon_beta=1.0,
):
    """Pallas port of IsolatedTripletLoss.forward (bce=False, squared_triplet=False)."""
    anchor, positive, negative = triplet_data
    cfg = _chip_config()
    num_splits = cfg["num_splits"]

    # Slice similarity subspace and transpose so batch is the lane (last) axis.
    a_t = anchor[:, :similarity_dim].T       # (sim_dim, B)
    p_t = positive[:, :similarity_dim].T
    n_t = negative[:, :similarity_dim].T
    mean_t = mean.T                          # (latent_dim, B)
    logvar_t = logvar.T

    # Flatten images to a lane-dense slab.  No full-array pad: when the element
    # count is a multiple of 128 we reshape directly (no copy) and let the grid
    # over-cover the tail; an in-kernel mask zeroes the invalid rows.
    total = real_data.size
    lane_rows = pl.cdiv(total, _LANES)
    lane_pad = lane_rows * _LANES - total

    flat_r = real_data.reshape(-1)
    flat_f = fake_data.reshape(-1)
    if lane_pad:
        # Rare fallback: element count not a multiple of 128.  Zero-padding
        # BOTH tensors contributes 0 to the squared-error sum.
        flat_r = jnp.pad(flat_r, (0, lane_pad))
        flat_f = jnp.pad(flat_f, (0, lane_pad))
    real2d = flat_r.reshape(lane_rows, _LANES)   # kept in incoming dtype
    fake2d = flat_f.reshape(lane_rows, _LANES)   # (bf16 stays bf16 on the wire)

    # Dtype-aware minimum sublane multiple for the image tiles.
    itemsize = int(jnp.dtype(real2d.dtype).itemsize)
    sub_mult = 8 * max(1, 4 // max(itemsize, 1))     # f32->8, bf16->16, int8->32

    rows = lane_rows
    tile_rows = min(cfg["tile_rows_max"],
                    _round_up(pl.cdiv(rows, num_splits), sub_mult))
    if rows < tile_rows:
        # Tiny input: pad a handful of zero rows (few KiB) so a block never
        # exceeds the array extent.  Zero rows contribute 0 to the sum.
        extra = tile_rows - rows
        real2d = jnp.pad(real2d, ((0, extra), (0, 0)))
        fake2d = jnp.pad(fake2d, ((0, extra), (0, 0)))
        rows = tile_rows

    tiles_per_split = pl.cdiv(rows, num_splits * tile_rows)
    num_grid_blocks = num_splits * tiles_per_split
    full_blocks = rows // tile_rows                   # blocks fully inside valid rows
    needs_mask = num_grid_blocks > full_blocks
    last_valid_block = max(pl.cdiv(rows, tile_rows) - 1, 0)

    if num_grid_blocks > last_valid_block + 1:
        # Some grid steps map past the last real block: clamp the DMA source;
        # the in-kernel row mask zeroes their contribution.
        def img_map(c, i):
            return (jnp.minimum(c * tiles_per_split + i, last_valid_block), 0)
    else:
        def img_map(c, i):
            return (c * tiles_per_split + i, 0)

    diff_in_input_dtype = (real2d.dtype == jnp.bfloat16
                           and fake2d.dtype == jnp.bfloat16
                           and cfg["bf16_valu"])

    kernel = functools.partial(
        _isolated_triplet_loss_kernel,
        tile_rows=tile_rows, tiles_per_split=tiles_per_split,
        valid_rows=rows, full_blocks=full_blocks, needs_mask=bool(needs_mask),
        diff_in_input_dtype=bool(diff_in_input_dtype),
        triplet_margin=float(triplet_margin),
    )

    img_spec = pl.BlockSpec((tile_rows, _LANES), img_map)
    resident = lambda shape: pl.BlockSpec(shape, lambda c, i: (0, 0))
    per_core_out = pl.BlockSpec((8, _LANES), lambda c, i: (c, 0))

    small_bytes = (mean_t.size + logvar_t.size + a_t.size + p_t.size
                   + n_t.size) * 4 + 2 * num_splits * 8 * _LANES * 4
    cost = pl.CostEstimate(
        flops=3 * int(total),
        transcendentals=int(mean.size + 4 * a_t.shape[-1]),
        bytes_accessed=int((real2d.size + fake2d.size) * itemsize + small_bytes),
    )

    partials, latent_vec = pl.pallas_call(
        kernel,
        grid=(num_splits, tiles_per_split),
        in_specs=[
            img_spec,                    # real
            img_spec,                    # fake
            resident(mean_t.shape),      # mean   [latent_dim, B]
            resident(logvar_t.shape),    # logvar [latent_dim, B]
            resident(a_t.shape),         # anchor [sim_dim, B]
            resident(p_t.shape),         # positive
            resident(n_t.shape),         # negative
        ],
        out_specs=(per_core_out, per_core_out),
        out_shape=(
            jax.ShapeDtypeStruct((num_splits * 8, _LANES), jnp.float32),
            jax.ShapeDtypeStruct((num_splits * 8, _LANES), jnp.float32),
        ),
        compiler_params=pltpu.CompilerParams(
            # TODO(synk): on v7x, confirm in xprof that "parallel" shards the
            # split axis across both TensorCores; else switch to CORE_PARALLEL.
            dimension_semantics=("parallel", "arbitrary"),
            vmem_limit_bytes=cfg["vmem_limit"],
        ),
        cost_estimate=cost,
    )(real2d, fake2d, mean_t, logvar_t, a_t, p_t, n_t)

    # Combine per-core per-lane partial sums (tiny scalar glue); divide by the
    # GLOBAL (unpadded) element count.
    recon = jnp.sum(partials) / float(total)
    trip = latent_vec[0, 0]
    kl = latent_vec[0, 1]
    pct = latent_vec[0, 2]
    loss = recon_beta * recon + kl_beta * kl + triplet_beta * trip

    return {
        "loss": loss,
        "triplet_loss": trip,
        "recon_loss": recon,
        "kl_divergence_loss": kl,
        "triplet_percentage": pct,
    }


# ------------------------------- reference --------------------------------- #

def _reference(real_data, fake_data, mean, logvar, triplet_data,
               kl_beta=1.0, triplet_beta=1.0, triplet_margin=1.0,
               similarity_dim=2, recon_beta=1.0):
    anchor, positive, negative = triplet_data
    a = anchor[:, :similarity_dim].astype(jnp.float32)
    p = positive[:, :similarity_dim].astype(jnp.float32)
    n = negative[:, :similarity_dim].astype(jnp.float32)
    eps = 1e-6
    d_ap = jnp.linalg.norm(a - p + eps, axis=-1)
    d_an = jnp.linalg.norm(a - n + eps, axis=-1)
    trip = jnp.mean(jnp.maximum(d_ap - d_an + triplet_margin, 0.0))
    recon = jnp.mean((fake_data.astype(jnp.float32) - real_data.astype(jnp.float32)) ** 2)
    kl = -0.5 * jnp.mean(1.0 + logvar - mean**2 - jnp.exp(logvar))
    pct = jnp.sum(
        (jnp.linalg.norm(a - p, axis=-1) < jnp.linalg.norm(a - n, axis=-1))
        .astype(jnp.float32)) / a.shape[0]
    loss = recon_beta * recon + kl_beta * kl + triplet_beta * trip
    return {"loss": loss, "triplet_loss": trip, "recon_loss": recon,
            "kl_divergence_loss": kl, "triplet_percentage": pct}


# --------------------------------- main ------------------------------------ #

if __name__ == "__main__":
    key = jax.random.PRNGKey(0)
    k = jax.random.split(key, 8)

    B, C, H, W = 2, 4, 16, 16          # real/fake images (NCHW)
    latent_dim = 4                     # encoder latent size
    similarity_dim = 2                 # similarity subspace used for triplets

    real_data = jax.random.uniform(k[0], (B, C, H, W), dtype=jnp.float32)
    fake_data = jax.random.uniform(k[1], (B, C, H, W), dtype=jnp.float32)
    mean = jax.random.normal(k[2], (B, latent_dim), dtype=jnp.float32)
    logvar = 0.1 * jax.random.normal(k[3], (B, latent_dim), dtype=jnp.float32)
    anchor = jax.random.normal(k[4], (B, latent_dim), dtype=jnp.float32)
    positive = jax.random.normal(k[5], (B, latent_dim), dtype=jnp.float32)
    negative = jax.random.normal(k[6], (B, latent_dim), dtype=jnp.float32)

    # TODO(synk): the module's nn.Linear(1, 1) (empty_linear) is never used in
    # forward(), so it has no kernel equivalent.
    triplet_data = (anchor, positive, negative)

    out = isolated_triplet_loss(
        real_data, fake_data, mean, logvar, triplet_data,
        kl_beta=1.0, triplet_beta=1.0, triplet_margin=1.0,
        similarity_dim=similarity_dim, recon_beta=1.0,
    )
    out = jax.block_until_ready(out)

    ref = _reference(
        real_data, fake_data, mean, logvar, triplet_data,
        kl_beta=1.0, triplet_beta=1.0, triplet_margin=1.0,
        similarity_dim=similarity_dim, recon_beta=1.0,
    )
    for name in out:
        assert jnp.allclose(out[name], ref[name], atol=1e-5, rtol=1e-5), (
            f"mismatch in {name}: {out[name]} vs {ref[name]}")

    print("KERNEL_OK")
</pallas_src>

<mosaic_0001>
module attributes {stable_mosaic.version = 11 : i64} {
  func.func @_isolated_triplet_loss_kernel(%arg0: i32, %arg1: i32, %arg2: memref<8x128xf32, #tpu.memory_space<vmem>>, %arg3: memref<8x128xf32, #tpu.memory_space<vmem>>, %arg4: memref<4x2xf32, #tpu.memory_space<vmem>>, %arg5: memref<4x2xf32, #tpu.memory_space<vmem>>, %arg6: memref<2x2xf32, #tpu.memory_space<vmem>>, %arg7: memref<2x2xf32, #tpu.memory_space<vmem>>, %arg8: memref<2x2xf32, #tpu.memory_space<vmem>>, %arg9: memref<8x128xf32, #tpu.memory_space<vmem>>, %arg10: memref<8x128xf32, #tpu.memory_space<vmem>>) attributes {dimension_semantics = [#tpu.dimension_semantics<parallel>, #tpu.dimension_semantics<arbitrary>], iteration_bounds = array<i64: 2, 1>, scalar_prefetch = 0 : i64, scratch_operands = 0 : i64, tpu.core_type = #tpu.core_type<tc>, window_params = [{transform_indices = @transform_0, window_bounds = array<i64: 8, 128>}, {transform_indices = @transform_1, window_bounds = array<i64: 8, 128>}, {pipeline_mode = #tpu.pipeline_mode<synchronous>, transform_indices = @transform_2, window_bounds = array<i64: 4, 2>}, {pipeline_mode = #tpu.pipeline_mode<synchronous>, transform_indices = @transform_3, window_bounds = array<i64: 4, 2>}, {pipeline_mode = #tpu.pipeline_mode<synchronous>, transform_indices = @transform_4, window_bounds = array<i64: 2, 2>}, {pipeline_mode = #tpu.pipeline_mode<synchronous>, transform_indices = @transform_5, window_bounds = array<i64: 2, 2>}, {pipeline_mode = #tpu.pipeline_mode<synchronous>, transform_indices = @transform_6, window_bounds = array<i64: 2, 2>}, {transform_indices = @transform_7, window_bounds = array<i64: 8, 128>}, {transform_indices = @transform_8, window_bounds = array<i64: 8, 128>}]} {
    %c0_i32 = arith.constant 0 : i32
    %0 = arith.cmpi eq, %arg1, %c0_i32 : i32
    %1 = arith.extui %0 : i1 to i32
    %c0_i32_0 = arith.constant 0 : i32
    %2 = arith.cmpi ne, %1, %c0_i32_0 : i32
    scf.if %2 {
      %cst_11 = arith.constant 0.000000e+00 : f32
      %17 = vector.broadcast %cst_11 : f32 to vector<8x128xf32>
      %c0_12 = arith.constant 0 : index
      %c0_13 = arith.constant 0 : index
      %18 = vector.load %arg9[%c0_12, %c0_13] : memref<8x128xf32, #tpu.memory_space<vmem>>, vector<8x128xf32>
      tpu.vector_store %arg9[%c0_12, %c0_13], %17 {strides = array<i32>} : memref<8x128xf32, #tpu.memory_space<vmem>>, vector<8x128xf32>,
    } else {
    }
    %c0 = arith.constant 0 : index
    %c0_1 = arith.constant 0 : index
    %3 = vector.load %arg3[%c0, %c0_1] : memref<8x128xf32, #tpu.memory_space<vmem>>, vector<8x128xf32>
    %c0_2 = arith.constant 0 : index
    %c0_3 = arith.constant 0 : index
    %4 = vector.load %arg2[%c0_2, %c0_3] : memref<8x128xf32, #tpu.memory_space<vmem>>, vector<8x128xf32>
    %5 = arith.subf %3, %4 : vector<8x128xf32>
    %6 = arith.mulf %5, %5 : vector<8x128xf32>
    %c0_4 = arith.constant 0 : index
    %c0_5 = arith.constant 0 : index
    %7 = vector.load %arg9[%c0_4, %c0_5] : memref<8x128xf32, #tpu.memory_space<vmem>>, vector<8x128xf32>
    %8 = vector.shape_cast %6 : vector<8x128xf32> to vector<1x8x128xf32>
    %cst = arith.constant dense<0.000000e+00> : vector<8x128xf32>
    %9 = vector.multi_reduction <add>, %8, %cst [0] : vector<1x8x128xf32> to vector<8x128xf32>
    %10 = arith.addf %7, %9 : vector<8x128xf32>
    %c0_6 = arith.constant 0 : index
    %c0_7 = arith.constant 0 : index
    %11 = vector.load %arg9[%c0_6, %c0_7] : memref<8x128xf32, #tpu.memory_space<vmem>>, vector<8x128xf32>
    tpu.vector_store %arg9[%c0_6, %c0_7], %10 {strides = array<i32>} : memref<8x128xf32, #tpu.memory_space<vmem>>, vector<8x128xf32>,
    %c0_i32_8 = arith.constant 0 : i32
    %12 = arith.cmpi eq, %arg1, %c0_i32_8 : i32
    %c0_i32_9 = arith.constant 0 : i32
    %13 = arith.cmpi eq, %arg0, %c0_i32_9 : i32
    %14 = arith.andi %12, %13 : i1
    %15 = arith.extui %14 : i1 to i32
    %c0_i32_10 = arith.constant 0 : i32
    %16 = arith.cmpi ne, %15, %c0_i32_10 : i32
    scf.if %16 {
      %c0_11 = arith.constant 0 : index
      %c0_12 = arith.constant 0 : index
      %17 = vector.load %arg4[%c0_11, %c0_12] : memref<4x2xf32, #tpu.memory_space<vmem>>, vector<4x2xf32>
      %c0_13 = arith.constant 0 : index
      %c0_14 = arith.constant 0 : index
      %18 = vector.load %arg5[%c0_13, %c0_14] : memref<4x2xf32, #tpu.memory_space<vmem>>, vector<4x2xf32>
      %cst_15 = arith.constant 1.000000e+00 : f32
      %19 = vector.broadcast %cst_15 : f32 to vector<4x2xf32>
      %20 = arith.addf %19, %18 : vector<4x2xf32>
      %21 = arith.mulf %17, %17 : vector<4x2xf32>
      %22 = arith.subf %20, %21 : vector<4x2xf32>
      %23 = math.exp %18 : vector<4x2xf32>
      %24 = arith.subf %22, %23 : vector<4x2xf32>
      %25 = vector.shape_cast %24 : vector<4x2xf32> to vector<1x4x2xf32>
      %cst_16 = arith.constant dense<0.000000e+00> : vector<1xf32>
      %26 = vector.multi_reduction <add>, %25, %cst_16 [1, 2] : vector<1x4x2xf32> to vector<1xf32>
      %27 = vector.shape_cast %26 : vector<1xf32> to vector<1x1x1xf32>
      %28 = vector.extract %27[0, 0, 0] : f32 from vector<1x1x1xf32>
      %29 = vector.broadcast %28 : f32 to vector<1x1xf32>
      %cst_17 = arith.constant 8.000000e+00 : f32
      %30 = vector.broadcast %cst_17 : f32 to vector<1x1xf32>
      %31 = arith.divf %29, %30 : vector<1x1xf32>
      %cst_18 = arith.constant -5.000000e-01 : f32
      %32 = vector.broadcast %cst_18 : f32 to vector<1x1xf32>
      %33 = arith.mulf %32, %31 : vector<1x1xf32>
      %c0_19 = arith.constant 0 : index
      %c0_20 = arith.constant 0 : index
      %34 = vector.load %arg6[%c0_19, %c0_20] : memref<2x2xf32, #tpu.memory_space<vmem>>, vector<2x2xf32>
      %c0_21 = arith.constant 0 : index
      %c0_22 = arith.constant 0 : index
      %35 = vector.load %arg7[%c0_21, %c0_22] : memref<2x2xf32, #tpu.memory_space<vmem>>, vector<2x2xf32>
      %c0_23 = arith.constant 0 : index
      %c0_24 = arith.constant 0 : index
      %36 = vector.load %arg8[%c0_23, %c0_24] : memref<2x2xf32, #tpu.memory_space<vmem>>, vector<2x2xf32>
      %37 = arith.subf %34, %35 : vector<2x2xf32>
      %cst_25 = arith.constant 9.99999997E-7 : f32
      %38 = vector.broadcast %cst_25 : f32 to vector<2x2xf32>
      %39 = arith.addf %37, %38 : vector<2x2xf32>
      %40 = arith.mulf %39, %39 : vector<2x2xf32>
      %cst_26 = arith.constant dense<0.000000e+00> : vector<2xf32>
      %41 = vector.multi_reduction <add>, %40, %cst_26 [0] : vector<2x2xf32> to vector<2xf32>
      %42 = vector.shape_cast %41 : vector<2xf32> to vector<1x2xf32>
      %43 = math.sqrt %42 : vector<1x2xf32>
      %44 = arith.subf %34, %36 : vector<2x2xf32>
      %cst_27 = arith.constant 9.99999997E-7 : f32
      %45 = vector.broadcast %cst_27 : f32 to vector<2x2xf32>
      %46 = arith.addf %44, %45 : vector<2x2xf32>
      %47 = arith.mulf %46, %46 : vector<2x2xf32>
      %cst_28 = arith.constant dense<0.000000e+00> : vector<2xf32>
      %48 = vector.multi_reduction <add>, %47, %cst_28 [0] : vector<2x2xf32> to vector<2xf32>
      %49 = vector.shape_cast %48 : vector<2xf32> to vector<1x2xf32>
      %50 = math.sqrt %49 : vector<1x2xf32>
      %51 = arith.subf %43, %50 : vector<1x2xf32>
      %cst_29 = arith.constant 1.000000e+00 : f32
      %52 = vector.broadcast %cst_29 : f32 to vector<1x2xf32>
      %53 = arith.addf %51, %52 : vector<1x2xf32>
      %cst_30 = arith.constant 0.000000e+00 : f32
      %54 = vector.broadcast %cst_30 : f32 to vector<1x2xf32>
      %55 = arith.maximumf %53, %54 : vector<1x2xf32>
      %56 = vector.shape_cast %55 : vector<1x2xf32> to vector<1x1x2xf32>
      %cst_31 = arith.constant dense<0.000000e+00> : vector<1xf32>
      %57 = vector.multi_reduction <add>, %56, %cst_31 [1, 2] : vector<1x1x2xf32> to vector<1xf32>
      %58 = vector.shape_cast %57 : vector<1xf32> to vector<1x1x1xf32>
      %59 = vector.extract %58[0, 0, 0] : f32 from vector<1x1x1xf32>
      %60 = vector.broadcast %59 : f32 to vector<1x1xf32>
      %cst_32 = arith.constant 2.000000e+00 : f32
      %61 = vector.broadcast %cst_32 : f32 to vector<1x1xf32>
      %62 = arith.divf %60, %61 : vector<1x1xf32>
      %63 = arith.subf %34, %35 : vector<2x2xf32>
      %64 = arith.mulf %63, %63 : vector<2x2xf32>
      %cst_33 = arith.constant dense<0.000000e+00> : vector<2xf32>
      %65 = vector.multi_reduction <add>, %64, %cst_33 [0] : vector<2x2xf32> to vector<2xf32>
      %66 = vector.shape_cast %65 : vector<2xf32> to vector<1x2xf32>
      %67 = math.sqrt %66 : vector<1x2xf32>
      %68 = arith.subf %34, %36 : vector<2x2xf32>
      %69 = arith.mulf %68, %68 : vector<2x2xf32>
      %cst_34 = arith.constant dense<0.000000e+00> : vector<2xf32>
      %70 = vector.multi_reduction <add>, %69, %cst_34 [0] : vector<2x2xf32> to vector<2xf32>
      %71 = vector.shape_cast %70 : vector<2xf32> to vector<1x2xf32>
      %72 = math.sqrt %71 : vector<1x2xf32>
      %73 = arith.cmpf olt, %67, %72 : vector<1x2xf32>
      %74 = arith.extui %73 : vector<1x2xi1> to vector<1x2xi32>
      %75 = arith.sitofp %74 : vector<1x2xi32> to vector<1x2xf32>
      %76 = vector.shape_cast %75 : vector<1x2xf32> to vector<1x1x2xf32>
      %cst_35 = arith.constant dense<0.000000e+00> : vector<1xf32>
      %77 = vector.multi_reduction <add>, %76, %cst_35 [1, 2] : vector<1x1x2xf32> to vector<1xf32>
      %78 = vector.shape_cast %77 : vector<1xf32> to vector<1x1x1xf32>
      %79 = vector.extract %78[0, 0, 0] : f32 from vector<1x1x1xf32>
      %80 = vector.broadcast %79 : f32 to vector<1x1xf32>
      %cst_36 = arith.constant 2.000000e+00 : f32
      %81 = vector.broadcast %cst_36 : f32 to vector<1x1xf32>
      %82 = arith.divf %80, %81 : vector<1x1xf32>
      %83 = tpu.iota {dimensions = array<i32: 0>} : vector<8x128xi32>
      %84 = tpu.iota {dimensions = array<i32: 1>} : vector<8x128xi32>
      %c0_i32_37 = arith.constant 0 : i32
      %85 = vector.broadcast %c0_i32_37 : i32 to vector<8x128xi32>
      %86 = arith.cmpi eq, %83, %85 : vector<8x128xi32>
      %c0_i32_38 = arith.constant 0 : i32
      %87 = vector.broadcast %c0_i32_38 : i32 to vector<8x128xi32>
      %88 = arith.cmpi eq, %84, %87 : vector<8x128xi32>
      %89 = arith.andi %86, %88 : vector<8x128xi1>
      %cst_39 = arith.constant 0.000000e+00 : f32
      %90 = vector.shape_cast %62 : vector<1x1xf32> to vector<1x1xf32>
      %91 = vector.broadcast %90 : vector<1x1xf32> to vector<8x128xf32>
      %92 = vector.broadcast %cst_39 : f32 to vector<8x128xf32>
      %93 = arith.select %89, %91, %92 : vector<8x128xi1>, vector<8x128xf32>
      %c1_i32 = arith.constant 1 : i32
      %94 = vector.broadcast %c1_i32 : i32 to vector<8x128xi32>
      %95 = arith.cmpi eq, %84, %94 : vector<8x128xi32>
      %96 = arith.andi %86, %95 : vector<8x128xi1>
      %cst_40 = arith.constant 0.000000e+00 : f32
      %97 = vector.shape_cast %33 : vector<1x1xf32> to vector<1x1xf32>
      %98 = vector.broadcast %97 : vector<1x1xf32> to vector<8x128xf32>
      %99 = vector.broadcast %cst_40 : f32 to vector<8x128xf32>
      %100 = arith.select %96, %98, %99 : vector<8x128xi1>, vector<8x128xf32>
      %101 = arith.addf %93, %100 : vector<8x128xf32>
      %c2_i32 = arith.constant 2 : i32
      %102 = vector.broadcast %c2_i32 : i32 to vector<8x128xi32>
      %103 = arith.cmpi eq, %84, %102 : vector<8x128xi32>
      %104 = arith.andi %86, %103 : vector<8x128xi1>
      %cst_41 = arith.constant 0.000000e+00 : f32
      %105 = vector.shape_cast %82 : vector<1x1xf32> to vector<1x1xf32>
      %106 = vector.broadcast %105 : vector<1x1xf32> to vector<8x128xf32>
      %107 = vector.broadcast %cst_41 : f32 to vector<8x128xf32>
      %108 = arith.select %104, %106, %107 : vector<8x128xi1>, vector<8x128xf32>
      %109 = arith.addf %101, %108 : vector<8x128xf32>
      %c0_42 = arith.constant 0 : index
      %c0_43 = arith.constant 0 : index
      %110 = vector.load %arg10[%c0_42, %c0_43] : memref<8x128xf32, #tpu.memory_space<vmem>>, vector<8x128xf32>
      tpu.vector_store %arg10[%c0_42, %c0_43], %109 {strides = array<i32>} : memref<8x128xf32, #tpu.memory_space<vmem>>, vector<8x128xf32>,
    } else {
    }
    return
  }
  func.func @transform_0(%arg0: i32, %arg1: i32) -> (i32, i32) {
    %c1_i32 = arith.constant 1 : i32
    %0 = arith.muli %arg0, %c1_i32 : i32
    %1 = arith.addi %0, %arg1 : i32
    %c0_i32 = arith.constant 0 : i32
    %c0_i32_0 = arith.constant 0 : i32
    return %1, %c0_i32 : i32, i32
  }
  func.func @transform_1(%arg0: i32, %arg1: i32) -> (i32, i32) {
    %c1_i32 = arith.constant 1 : i32
    %0 = arith.muli %arg0, %c1_i32 : i32
    %1 = arith.addi %0, %arg1 : i32
    %c0_i32 = arith.constant 0 : i32
    %c0_i32_0 = arith.constant 0 : i32
    return %1, %c0_i32 : i32, i32
  }
  func.func @transform_2(%arg0: i32, %arg1: i32) -> (i32, i32) {
    %c0_i32 = arith.constant 0 : i32
    %c0_i32_0 = arith.constant 0 : i32
    %c0_i32_1 = arith.constant 0 : i32
    return %c0_i32, %c0_i32_0 : i32, i32
  }
  func.func @transform_3(%arg0: i32, %arg1: i32) -> (i32, i32) {
    %c0_i32 = arith.constant 0 : i32
    %c0_i32_0 = arith.constant 0 : i32
    %c0_i32_1 = arith.constant 0 : i32
    return %c0_i32, %c0_i32_0 : i32, i32
  }
  func.func @transform_4(%arg0: i32, %arg1: i32) -> (i32, i32) {
    %c0_i32 = arith.constant 0 : i32
    %c0_i32_0 = arith.constant 0 : i32
    %c0_i32_1 = arith.constant 0 : i32
    return %c0_i32, %c0_i32_0 : i32, i32
  }
  func.func @transform_5(%arg0: i32, %arg1: i32) -> (i32, i32) {
    %c0_i32 = arith.constant 0 : i32
    %c0_i32_0 = arith.constant 0 : i32
    %c0_i32_1 = arith.constant 0 : i32
    return %c0_i32, %c0_i32_0 : i32, i32
  }
  func.func @transform_6(%arg0: i32, %arg1: i32) -> (i32, i32) {
    %c0_i32 = arith.constant 0 : i32
    %c0_i32_0 = arith.constant 0 : i32
    %c0_i32_1 = arith.constant 0 : i32
    return %c0_i32, %c0_i32_0 : i32, i32
  }
  func.func @transform_7(%arg0: i32, %arg1: i32) -> (i32, i32) {
    %c0_i32 = arith.constant 0 : i32
    %c0_i32_0 = arith.constant 0 : i32
    return %arg0, %c0_i32 : i32, i32
  }
  func.func @transform_8(%arg0: i32, %arg1: i32) -> (i32, i32) {
    %c0_i32 = arith.constant 0 : i32
    %c0_i32_0 = arith.constant 0 : i32
    return %arg0, %c0_i32 : i32, i32
  }
}

</mosaic_0001>

<bundles_post_ra>
// kernel: tpu_custom_call.1
= control target key start
LH: loop header
LB: loop body
LE: loop exit
PB: predicated region body
PF: predicated region fallthrough
CT: control target
= control target key end

     0   :  { %s1262_s0 = inlined_call_operand.hbm [shape: f32[16,128], index: 0, kind: input, shape index: {}]   ;;  %s1263_s1 = inlined_call_operand.hbm [shape: f32[16,128], index: 1, kind: input, shape index: {}]   ;;  %s1264_s2 = inlined_call_operand.vmem [shape: f32[4,2], index: 2, kind: input, shape index: {}]   ;;  %s1265_s3 = inlined_call_operand.vmem [shape: f32[4,2], index: 3, kind: input, shape index: {}]   ;;  %s1266_s4 = inlined_call_operand.vmem [shape: f32[2,2], index: 4, kind: input, shape index: {}]   ;;  %s1267_s5 = inlined_call_operand.vmem [shape: f32[2,2], index: 5, kind: input, shape index: {}]   ;;  %s1268_s6 = inlined_call_operand.vmem [shape: f32[2,2], index: 6, kind: input, shape index: {}]   ;;  %s1269_s7 = inlined_call_operand.hbm [shape: f32[16,128], index: 7, kind: output, shape index: {0}]   ;;  %s1270_s8 = inlined_call_operand.hbm [shape: f32[16,128], index: 8, kind: output, shape index: {1}]  }
   0x1   :  { %1274 = sst [smem:[#allocation17_spill]] %s1262_s0 }
   0x2   :  { %14 = vsyncpa [#allocation3], 0 }
   0x3   :  { %16 = vsyncpa [#allocation3 + $0x1], 0 }
   0x4   :  { %17 = vsyncpa [#allocation6], 0 }
   0x5   :  { %19 = vsyncpa [#allocation6 + $0x1], 0 }
   0x6   :  { %20 = vsyncpa [#allocation4], 0 }
   0x7   :  { %22 = vsyncpa [#allocation4 + $0x1], 0 }
   0x8   :  { %23 = vsyncpa [#allocation9], 0 }
   0x9   :  { %25 = vsyncpa [#allocation9 + $0x1], 0  ;;  %s1048_s27 = smov 0   ;;  %s1050_s28 = smov 0  }
   0xa   :  { %s1052_s29 = smov 0   ;;  %s1054_s30 = smov 0  }
   0xb   :  { %s1056_s9 = smov 0   ;;  %s1058_s10 = smov 0  }
   0xc LB: > { %1275 = sst [smem:[#allocation14_spill]] %s992_s9  ;;  %s714_s11 = sadd.s32 4294967295, %s996_s10   ;;  %s996_s10 = sphi %s1058_s10, %s31_s10   ;;  %s992_s9 = sphi %s1056_s9, %s1289_s9   ;;  %s988_s30 = sphi %s1054_s30, %s1288_s30   ;;  %s984_s29 = sphi %s1052_s29, %s1292_s29   ;;  %s980_s28 = sphi %s1050_s28, %s1291_s28   ;;  %s976_s27 = sphi %s1048_s27, %s1290_s27  }
   0xd   : > { %s715_s12 = sadd.s32 4294967294, %s996_s10   ;;  %s43_s13 = sadd.s32 1, %s992_s9 }
   0xe   : > { %s52_s14 = sadd.s32 1, %s984_s29  ;;  %p45_p0 = scmp.ge.s32.totalorder %s43_s13, 2 }
   0xf   : > { %p59_p1 = scmp.ne.s32.totalorder %s984_s29, %s980_s28  ;;  %p60_p2 = scmp.eq.s32.totalorder %s996_s10, 0 }
  0x10   : > { %p65_p3 = scmp.ne.s32.totalorder %s980_s28, %s976_s27  ;;  %s1294_s13 = smov (%p45_p0, %s43_s13), 0 }
  0x11   : > { %1276 = sst [smem:[#allocation15_spill]] %s1294_s13  ;;  %p1089_p4 = por %p60_p2, %p59_p1 }
  0x12   : > { %p66_p5 = scmp.eq.s32.totalorder %s714_s11, 0  ;;  %s49_s16 = ssub.s32 %s992_s9, %s1294_s13 }
  0x13   : > { %p222_p6 = scmp.eq.s32.totalorder %s714_s11, 1  ;;  %p50_p7 = scmp.eq.s32.totalorder %s49_s16, 0 }
  0x14   : > { %p1095_p8 = por %p66_p5, %p65_p3  ;;  %p228_p10 = scmp.eq.s32.totalorder %s715_s12, 1 }
  0x15   : > { %p1099_p9 = por %p222_p6, %p59_p1  ;;  %p764_p13 = scmp.lt.s32.totalorder %s996_s10, 2 }
  0x16   : > { %s1104_s19 = scalar_select %p50_p7, %s984_s29, %s52_s14  }
  0x17   : > { %p1106_p11 = por %p228_p10, %p65_p3  ;;  %s1113_s21 = sand.u32 1, %s984_s29  }
  0x18   : > { %1280 = sst [smem:[#allocation16_spill]] %s1104_s19  ;;  %s718_s22 = sshll.u32 %s1113_s21, 3 }
  0x19   : > { %s719_s23 = sshll.u32 %s992_s9, 7  ;;  %s1282_s0 = sld [smem:[#allocation17_spill]] }
  0x1a   : > { %s293_s11 = scalar_lea.vmem [#allocation2], %s718_s22  ;;  %p1122_p0 = pnand %p764_p13, %p1089_p4 }
  0x1b   : > { %s301_s12 = sshll.u32 %s293_s11, 4  ;;  %p722_p1 = scmp.ge.s32.totalorder %s996_s10, 1  ;;  %s302_s12 = int_to_ptr.vmem [resolvable:$true] %s301_s12 }
  0x1c   : > { %p325_p2 = scmp.lt.s32.totalorder %s996_s10, 3  ;;  %s290_s16 = scalar_lea.sflag [#allocation3], %s1113_s21 }
  0x1d   : > { %p828_p3 = pneg %p1122_p0  ;;  %s839_s13 = scalar_lea.vmem %s302_s12, 128 }
  0x1e   : > { %p840_p5 = scmp.ne.s32.totalorder %s302_s12, %s839_s13  ;;  %s998_s24 = smov [#allocation2]  }
  0x1f   : > { %s299_s26 = scalar_lea.hbm %s1282_s0, %s719_s23  ;;  %s844_s25 = sshll.u32 %s998_s24, 4  ;;  %s845_s25 = int_to_ptr.vmem [resolvable:$false] %s844_s25 }
  0x20   : > { %p842_p6 = pnand %p840_p5, %p828_p3  ;;  %s846_s15 = scalar_lea.vmem %s845_s25, 256 }
  0x21   : > { %p847_p4 = scmp.lt.s32.totalorder %s302_s12, %s845_s25  ;;  %p848_p10 = scmp.lt.s32.totalorder %s846_s15, %s839_s13 }
  0x22   : > { %p843_p7 = pneg %p842_p6 }
  0x23   : > { %p849_p13 = por %p848_p10, %p847_p4 }
  0x25   : > { %p850_p12 = pnand %p849_p13, %p843_p7 }
  0x27   : > { %853 = shalt.err (!%p850_p12)
}
  0x28   : > { %753 = dma.hbm_to_vmem [thread:$0]  (!%p1122_p0), %s299_s26, 128, %s302_s12, %s290_s16  }
  0x29   : > { %p1140_p5 = pnand %p722_p1, %p325_p2  ;;  %s318_s13 = scalar_lea.hbm %s1263_s1, %s719_s23 }
  0x2a   : > { %s312_s25 = scalar_lea.vmem [#allocation5], %s718_s22  ;;  %s309_s9 = scalar_lea.sflag [#allocation6], %s1113_s21 }
  0x2b   : > { %s320_s15 = sshll.u32 %s312_s25, 4  ;;  %s999_s26 = smov [#allocation5]   ;;  %s321_s15 = int_to_ptr.vmem [resolvable:$true] %s320_s15 }
  0x2c   : > { %s867_s19 = scalar_lea.vmem %s321_s15, 128  ;;  %s872_s12 = sshll.u32 %s999_s26, 4  ;;  %s873_s12 = int_to_ptr.vmem [resolvable:$false] %s872_s12 }
  0x2d   : > { %p868_p12 = scmp.ne.s32.totalorder %s321_s15, %s867_s19  ;;  %s874_s16 = scalar_lea.vmem %s873_s12, 256 }
  0x2e   : > { %p875_p1 = scmp.lt.s32.totalorder %s321_s15, %s873_s12  ;;  %p876_p2 = scmp.lt.s32.totalorder %s874_s16, %s867_s19 }
  0x2f   : > { %p870_p6 = pnand %p868_p12, %p828_p3 }
  0x30   : > { %p877_p4 = por %p876_p2, %p875_p1 }
  0x31   : > { %p871_p7 = pneg %p870_p6 }
  0x33   : > { %p878_p10 = pnand %p877_p4, %p871_p7 }
  0x35   : > { %881 = shalt.err (!%p878_p10)
}
  0x36   : > { %756 = dma.hbm_to_vmem [thread:$0]  (!%p1122_p0), %s318_s13, 128, %s321_s15, %s309_s9  }
  0x37   : > { %329 = sbr.rel (%p1140_p5) target bundleno = 367 (0x16f), region = 48  ;;  %s1156_s0 = sand.u32 (!%p1140_p5), 1, %s980_s28  }
  0x38   : > { %s1159_s21 = sshll.u32 (!%p1140_p5), %s1156_s0, 3  ;;  %s332_s22 = scalar_lea.sflag (!%p1140_p5), [#allocation3], %s1156_s0 }
  0x39   : > { %s335_s19 = scalar_lea.vmem (!%p1140_p5), [#allocation2], %s1159_s21 }
  0x3c   : > { %959 = dma.done.wait (%p1095_p8), %s332_s22, 128  }
  0x3d   : > { %961 = vsyncadd (%p1095_p8), %s332_s22, 4294967168  ;;  %s341_s9 = scalar_lea.sflag [#allocation6], %s1156_s0  ;;  %s344_s23 = scalar_lea.vmem [#allocation5], %s1159_s21 }
  0x3e   : > { %963 = dma.done.wait (%p1095_p8), %s341_s9, 128  }
  0x3f   : > { %965 = vsyncadd (%p1095_p8), %s341_s9, 4294967168  ;;  %p402_p0 = scmp.eq.s32.totalorder %s988_s30, 0  ;;  %v394_v0 = vld [vmem:[%s344_s23] sm:$0xff]  ;;  %v395_v1 = vld [vmem:[%s335_s19] sm:$0xff]  ;;  %s379_s14 = scalar_lea.vmem [#allocation7], %s1159_s21 }
  0x40   : > { %v396_v2 = vsub.f32 %v394_v0, %v395_v1  ;;  %s1273_s11 = scalar_lea.vmem [#allocation8], %s1159_s21  ;;  %v408_v4 = vld [vmem:[%s1265_s3] sm:$0xf] (%p402_p0)  ;;  %vm436_vm0 = vcmask (%p402_p0), 9216   ;;  %vm415_vm1 = vcmask (%p402_p0), 11264   ;;  %vm471_vm6 = vcmask (%p402_p0), 8192  }
  0x41   : > { %406 = sbr.rel (!%p402_p0) target bundleno = 321 (0x141), region = 64  ;;  %v412_v5 = vmul.f32 (%p402_p0), 1.442695, %v408_v4  ;;  %v430_v6 = vld [vmem:[%s1266_s4] sm:$0x3] (%p402_p0)  ;;  %v409_v22 = vadd.f32 (%p402_p0), 1.0, %v408_v4 }
  0x42   : > { %v397_v3 = vmul.f32 %v396_v2, %v396_v2  ;;  %v431_v7 = vld [vmem:[%s1267_s5] sm:$0x3] (%p402_p0)  ;;  %v1000_v4 = vmov (%p402_p0), 0.0  }
  0x43   : > { %v432_v8 = vld [vmem:[%s1268_s6] sm:$0x3] (%p402_p0)  ;;  %816 = vpow2.f32 (%p402_p0), %v412_v5  ;;  %v433_v9 = vsub.f32 (%p402_p0), %v430_v6, %v431_v7 }
  0x44   : > { %401 = vst [vmem:[%s379_s14] sm:$0xff] %v397_v3  ;;  %v451_v10 = vsub.f32 (%p402_p0), %v430_v6, %v432_v8  ;;  %v407_v15 = vld [vmem:[%s1264_s2] sm:$0xf] (%p402_p0) }
  0x45   : > { %v485_v11 = vmul.f32 (%p402_p0), %v433_v9, %v433_v9  ;;  %v434_v13 = vadd.f32 (%p402_p0), 1e-06, %v433_v9  ;;  %v410_v23 = vmul.f32 (%p402_p0), %v407_v15, %v407_v15 }
  0x46   : > { %v500_v12 = vmul.f32 %v451_v10, %v451_v10  ;;  %v452_v14 = vadd.f32 1e-06, %v451_v10 }
  0x47   : > { %v486_v16 = vsel %vm436_vm0, %v485_v11, 0.0  ;;  %v435_v18 = vmul.f32 %v434_v13, %v434_v13  ;;  %v411_v34 = vsub.f32 %v409_v22, %v410_v23 }
  0x48   : > { %v501_v17 = vsel %vm436_vm0, %v500_v12, 0.0  ;;  %v453_v19 = vmul.f32 %v452_v14, %v452_v14  ;;  %v487_v20 = vrot.slane %v486_v16, 4 }
  0x49   : > { %v502_v21 = vrot.slane %v501_v17, 4  ;;  %v437_v24 = vsel %vm436_vm0, %v435_v18, 0.0 }
  0x4a   : > { %v454_v25 = vsel %vm436_vm0, %v453_v19, 0.0  ;;  %v488_v26 = vadd.f32 %v487_v20, %v486_v16  ;;  %v438_v28 = vrot.slane %v437_v24, 4 }
  0x4b   : > { %v503_v27 = vadd.f32 %v502_v21, %v501_v17  ;;  %v455_v29 = vrot.slane %v454_v25, 4 }
  0x4c   : > { %v489_v30 = vrot.slane %v488_v26, 2  ;;  %v439_v32 = vadd.f32 %v438_v28, %v437_v24 }
  0x4d   : > { %v504_v31 = vrot.slane %v503_v27, 2  ;;  %v456_v33 = vadd.f32 %v455_v29, %v454_v25 }
  0x4e   : > { %v490_v35 = vadd.f32 %v489_v30, %v488_v26  ;;  %v440_v37 = vrot.slane %v439_v32, 2 }
  0x4f   : > { %v505_v36 = vadd.f32 %v504_v31, %v503_v27  ;;  %v457_v38 = vrot.slane %v456_v33, 2 }
  0x50   : > { %v817_v39 = vpop.eup %816  ;;  %v491_v40 = vrot.slane %v490_v35, 1  ;;  %v441_v42 = vadd.f32 %v440_v37, %v439_v32 }
  0x51   : > { %v506_v41 = vrot.slane %v505_v36, 1  ;;  %v458_v43 = vadd.f32 %v457_v38, %v456_v33  ;;  %v414_v44 = vsub.f32 %v411_v34, %v817_v39 }
  0x52   : > { %v492_v45 = vadd.f32 %v491_v40, %v490_v35  ;;  %v442_v47 = vrot.slane %v441_v42, 1 }
  0x53   : > { %v507_v46 = vadd.f32 %v506_v41, %v505_v36  ;;  %v459_v48 = vrot.slane %v458_v43, 1  ;;  %v416_v49 = vsel %vm415_vm1, %v414_v44, 0.0  ;;  %v530_v36 = vlaneseq }
  0x54   : > { %417 = vadd.xlane.f32.xlu0 %v416_v49  ;;  %818 = vrsqrt.f32 %v492_v45  ;;  %v443_v50 = vadd.f32 %v442_v47, %v441_v42  ;;  %vm495_vm2 = vcmp.eq.f32.partialorder %v492_v45, inf  ;;  %v498_v53 = vand.u32 2147483648, %v492_v45 }
  0x55   : > { %820 = vrsqrt.f32 %v507_v46  ;;  %v460_v51 = vadd.f32 %v459_v48, %v458_v43  ;;  %vm497_vm3 = vcmp.eq.f32.partialorder %v492_v45, 0.0  ;;  %vm510_vm4 = vcmp.eq.f32.partialorder %v507_v46, inf }
  0x56   : > { %822 = vrsqrt.f32 %v443_v50  ;;  %v513_v56 = vand.u32 2147483648, %v507_v46  ;;  %vm512_vm5 = vcmp.eq.f32.partialorder %v507_v46, 0.0  ;;  %vm446_vm7 = vcmp.eq.f32.partialorder %v443_v50, inf }
  0x57   : > { %824 = vrsqrt.f32 %v460_v51  ;;  %vm448_vm8 = vcmp.eq.f32.partialorder %v443_v50, 0.0  ;;  %v449_v62 = vand.u32 2147483648, %v443_v50  ;;  %vm463_vm9 = vcmp.eq.f32.partialorder %v460_v51, inf }
  0x58   : > { %v466_v2 = vand.u32 2147483648, %v460_v51  ;;  %vm465_vm11 = vcmp.eq.f32.partialorder %v460_v51, 0.0  ;;  %v531_v38 = vshrl.u32 %v530_v36, 7  ;;  %v533_v39 = vand.u32 127, %v530_v36 }
  0x5a   : > { %vm534_vm12 = vcmp.eq.s32.totalorder %v531_v38, 0  ;;  %vm538_vm13 = vcmp.eq.s32.totalorder %v533_v39, 1  ;;  %vm535_vm14 = vcmp.eq.s32.totalorder %v533_v39, 0  ;;  %vm542_vm0 = vcmp.eq.s32.totalorder %v533_v39, 2 }
  0x5b   : > { %vm539_vm15 = vmand %vm534_vm12, %vm538_vm13 }
  0x5c   : > { %vm536_vm1 = vmand %vm534_vm12, %vm535_vm14 }
  0x61   : > { %v819_v52 = vpop.eup %818 }
  0x62   : > { %v821_v54 = vpop.eup %820  ;;  %v494_v55 = vmul.f32 %v819_v52, %v492_v45 }
  0x63   : > { %v509_v57 = vmul.f32 %v821_v54, %v507_v46  ;;  %v823_v59 = vpop.eup %822 }
  0x64   : > { %v496_v58 = vsel %vm495_vm2, %v492_v45, %v494_v55  ;;  %v825_v63 = vpop.eup %824  ;;  %v445_v1 = vmul.f32 %v823_v59, %v443_v50  ;;  %vm543_vm2 = vmand %vm534_vm12, %vm542_vm0 }
  0x65   : > { %v499_v60 = vsel %vm497_vm3, %v498_v53, %v496_v58  ;;  %v511_v61 = vsel %vm510_vm4, %v507_v46, %v509_v57  ;;  %v462_v3 = vmul.f32 %v825_v63, %v460_v51 }
  0x66   : > { %v514_v0 = vsel %vm512_vm5, %v513_v56, %v511_v61  ;;  %v447_v6 = vsel %vm446_vm7, %v443_v50, %v445_v1 }
  0x67   : > { %vm515_vm10 = vcmp.lt.f32.partialorder %v499_v60, %v514_v0  ;;  %v450_v8 = vsel %vm448_vm8, %v449_v62, %v447_v6  ;;  %v464_v9 = vsel %vm463_vm9, %v460_v51, %v462_v3 }
  0x68   : > { %v728_v5 = vsel %vm515_vm10, 1.0, %v1000_v4  ;;  %v467_v10 = vsel %vm465_vm11, %v466_v2, %v464_v9 }
  0x69   : > { %v518_v7 = vsel %vm471_vm6, %v728_v5, 0.0  ;;  %v468_v11 = vsub.f32 %v450_v8, %v467_v10 }
  0x6a   : > { %519 = vadd.xlane.f32.xlu1 %v518_v7 }
  0x6b   : > { %v469_v12 = vadd.f32 1.0, %v468_v11 }
  0x6d   : > { %v470_v13 = vmax.f32 %v469_v12, 0.0 }
  0x6f   : > { %v472_v14 = vsel %vm471_vm6, %v470_v13, 0.0 }
  0x70   : > { %473 = vadd.xlane.f32.xlu0 %v472_v14 }
  0xdd   : > { %v418_v15 = vpop.xlane.xlu0 %417 }
  0xde   : > { %v419_v16 = vrot.slane %v418_v15, 4 }
  0xe0   : > { %v420_v17 = vadd.f32 %v419_v16, %v418_v15 }
  0xe2   : > { %v421_v18 = vrot.slane %v420_v17, 2 }
  0xe4   : > { %v422_v19 = vadd.f32 %v421_v18, %v420_v17 }
  0xe6   : > { %v423_v20 = vrot.slane %v422_v19, 1 }
  0xe8   : > { %v424_v21 = vadd.f32 %v423_v20, %v422_v19 }
  0xea   : > { %736 = vpush %v424_v21 }
  0xf3   : > { %v520_v22 = vpop.xlane.xlu1 %519 }
  0xf4   : > { %v521_v23 = vrot.slane %v520_v22, 4 }
  0xf6   : > { %v522_v24 = vadd.f32 %v521_v23, %v520_v22 }
  0xf8   : > { %v523_v25 = vrot.slane %v522_v24, 2 }
  0xf9   : > { %v474_v26 = vpop.xlane.xlu0 %473 }
  0xfa   : > { %v475_v27 = vrot.slane %v474_v26, 4  ;;  %v524_v29 = vadd.f32 %v523_v25, %v522_v24 }
  0xfc   : > { %v476_v28 = vadd.f32 %v475_v27, %v474_v26  ;;  %v525_v32 = vrot.slane %v524_v29, 1 }
  0xfe   : > { %v477_v30 = vrot.slane %v476_v28, 2  ;;  %v526_v35 = vadd.f32 %v525_v32, %v524_v29 }
 0x100   : > { %v478_v31 = vadd.f32 %v477_v30, %v476_v28 }
 0x102   : > { %v479_v33 = vrot.slane %v478_v31, 1 }
 0x104   : > { %v480_v34 = vadd.f32 %v479_v33, %v478_v31 }
 0x106   : > { %738 = vpush %v480_v34 }
 0x107   : > { %740 = vpush %v526_v35 }
 0x11b   : > { %s737_s9 = spop %736 }
 0x11c   : > { %v426_v37 = vstv %s737_s9 }
 0x11d   : > { %v428_v40 = vmul.f32 0.125, %v426_v37 }
 0x11f   : > { %v429_v41 = vmul.f32 -0.5, %v428_v40 }
 0x121   : > { %v540_v46 = vsel %vm539_vm15, %v429_v41, 0.0 }
 0x137   : > { %s739_s23 = spop %738 }
 0x138   : > { %v482_v42 = vstv %s739_s23  ;;  %s741_s24 = spop %740 }
 0x139   : > { %v484_v43 = vmul.f32 0.5, %v482_v42  ;;  %v528_v44 = vstv %s741_s24 }
 0x13a   : > { %v529_v45 = vmul.f32 0.5, %v528_v44 }
 0x13b   : > { %v537_v47 = vsel %vm536_vm1, %v484_v43, 0.0 }
 0x13c   : > { %v541_v48 = vadd.f32 %v540_v46, %v537_v47  ;;  %v544_v49 = vsel %vm543_vm2, %v529_v45, 0.0 }
 0x13e   : > { %v545_v50 = vadd.f32 %v544_v49, %v541_v48 }
 0x140   : > { %546 = vst [vmem:[%s1273_s11] sm:$0xff] %v545_v50 }
 0x141 PF: > { %s731_s13 = sshll.u32 %s988_s30, 7  ;;  %s566_s26 = sshll.u32 %s379_s14, 4  ;;  %s567_s26 = int_to_ptr.vmem [resolvable:$true] %s566_s26 }
 0x142   : > { %s564_s15 = scalar_lea.hbm %s1269_s7, %s731_s13  ;;  %s548_s12 = scalar_lea.sflag [#allocation4], %s1156_s0 }
 0x143   : > { %s882_s16 = scalar_lea.vmem %s567_s26, 128  ;;  %s1001_s22 = smov [#allocation7]  }
 0x144   : > { %p883_p8 = scmp.ne.s32.totalorder %s567_s26, %s882_s16  ;;  %s886_s19 = sshll.u32 %s1001_s22, 4  ;;  %s887_s19 = int_to_ptr.vmem [resolvable:$false] %s886_s19 }
 0x145   : > { %s888_s9 = scalar_lea.vmem %s887_s19, 256  ;;  %p889_p5 = scmp.lt.s32.totalorder %s567_s26, %s887_s19 }
 0x146   : > { %p884_p3 = pnand %p883_p8, %p1099_p9  ;;  %p890_p12 = scmp.lt.s32.totalorder %s888_s9, %s882_s16 }
 0x148   : > { %p885_p13 = pneg %p884_p3  ;;  %p891_p6 = por %p890_p12, %p889_p5 }
 0x14a   : > { %p892_p7 = pnand %p891_p6, %p885_p13 }
 0x14c   : > { %895 = shalt.err (!%p892_p7)
}
 0x14d   : > { %s896_s23 = scalar_lea.hbm %s564_s15, 128  ;;  %s900_s17 = scalar_lea.hbm %s1269_s7, 256 }
 0x14e   : > { %p897_p1 = scmp.ne.s32.totalorder %s564_s15, %s896_s23  ;;  %p901_p10 = scmp.lt.s32.totalorder %s564_s15, %s1269_s7 }
 0x14f   : > { %p902_p0 = scmp.lt.s32.totalorder %s900_s17, %s896_s23 }
 0x150   : > { %p898_p2 = pnand %p897_p1, %p1099_p9 }
 0x151   : > { %p903_p8 = por %p902_p0, %p901_p10 }
 0x152   : > { %p899_p4 = pneg %p898_p2 }
 0x154   : > { %p904_p3 = pnand %p903_p8, %p899_p4 }
 0x156   : > { %907 = shalt.err (!%p904_p3)
}
 0x157   : > { %746 = dma.vmem_to_hbm [thread:$0]  (%p1099_p9), %s567_s26, 128, %s564_s15, %s548_s12  }
 0x158   : > { %s577_s19 = scalar_lea.hbm %s1270_s8, %s731_s13  ;;  %s1285_s9 = scalar_lea.vmem [#allocation8], %s1159_s21 }
 0x159   : > { %s579_s14 = sshll.u32 %s1285_s9, 4  ;;  %s553_s11 = scalar_lea.sflag [#allocation9], %s1156_s0  ;;  %s580_s14 = int_to_ptr.vmem [resolvable:$true] %s579_s14 }
 0x15a   : > { %s908_s23 = scalar_lea.vmem %s580_s14, 128  ;;  %s1002_s24 = smov [#allocation8]  }
 0x15b   : > { %p909_p13 = scmp.ne.s32.totalorder %s580_s14, %s908_s23  ;;  %s912_s17 = sshll.u32 %s1002_s24, 4  ;;  %s913_s17 = int_to_ptr.vmem [resolvable:$false] %s912_s17 }
 0x15c   : > { %s914_s25 = scalar_lea.vmem %s913_s17, 256  ;;  %p915_p6 = scmp.lt.s32.totalorder %s580_s14, %s913_s17 }
 0x15d   : > { %p910_p5 = pnand %p909_p13, %p1099_p9  ;;  %p916_p7 = scmp.lt.s32.totalorder %s914_s25, %s908_s23 }
 0x15f   : > { %p911_p12 = pneg %p910_p5  ;;  %p917_p1 = por %p916_p7, %p915_p6 }
 0x161   : > { %p918_p2 = pnand %p917_p1, %p911_p12 }
 0x163   : > { %921 = shalt.err (!%p918_p2)
}
 0x164   : > { %s922_s30 = scalar_lea.hbm %s577_s19, 128  ;;  %s926_s13 = scalar_lea.hbm %s1270_s8, 256 }
 0x165   : > { %p923_p4 = scmp.ne.s32.totalorder %s577_s19, %s922_s30  ;;  %p927_p8 = scmp.lt.s32.totalorder %s577_s19, %s1270_s8 }
 0x166   : > { %p928_p3 = scmp.lt.s32.totalorder %s926_s13, %s922_s30 }
 0x167   : > { %p924_p10 = pnand %p923_p4, %p1099_p9 }
 0x168   : > { %p929_p13 = por %p928_p3, %p927_p8 }
 0x169   : > { %p925_p0 = pneg %p924_p10 }
 0x16b   : > { %p930_p5 = pnand %p929_p13, %p925_p0 }
 0x16d   : > { %933 = shalt.err (!%p930_p5)
}
 0x16e   : > { %747 = dma.vmem_to_hbm [thread:$0]  (%p1099_p9), %s580_s14, 128, %s577_s19, %s553_s11  }
 0x16f PF: > { %s591_s12 = sand.u32 1, %s976_s27   ;;  %p1286_p12 = scmp.ge.s32.totalorder %s996_s10, 2 }
 0x170   : > { %s592_s16 = scalar_lea.sflag [#allocation4], %s591_s12 }
 0x171   : > { %p758_p6 = pnand %p1286_p12, %p1106_p11 }
 0x173   : > { %p759_p7 = pneg %p758_p6 }
 0x175   : > { %967 = dma.done.wait (%p759_p7), %s592_s16, 128  }
 0x176   : > { %969 = vsyncadd (%p759_p7), %s592_s16, 4294967168  ;;  %s601_s22 = scalar_lea.sflag [#allocation9], %s591_s12 }
 0x177   : > { %971 = dma.done.wait (%p759_p7), %s601_s22, 128  }
 0x178   : > { %973 = vsyncadd (%p759_p7), %s601_s22, 4294967168  ;;  %s31_s10 = sadd.s32 1, %s996_s10   ;;  %s1287_s18 = sld [smem:[#allocation16_spill]] }
 0x179   : > { %p28_p1 = scmp.ge.s32.totalorder %s31_s10, 4   ;;  %s1288_s30 = sld [smem:[#allocation14_spill]] }
 0x17a   : > { %s1289_s9 = sld [smem:[#allocation15_spill]]  ;;  %s1290_s27 = smov %s980_s28 }
 0x17b   : > { %s1291_s28 = smov %s984_s29  ;;  %30 = sbr.rel (!%p28_p1) target bundleno = 12 (0xc), region = 131 }
 0x17e   : > { %s1292_s29 = smov %s1287_s18 }
 0x180   :  { %606 = vsyncpa [#allocation3], 1 }
 0x181   :  { %608 = vsyncpa [#allocation3 + $0x1], 1 }
 0x182   :  { %609 = vsyncpa [#allocation6], 1 }
 0x183   :  { %611 = vsyncpa [#allocation6 + $0x1], 1 }
 0x184   :  { %612 = vsyncpa [#allocation4], 1 }
 0x185   :  { %614 = vsyncpa [#allocation4 + $0x1], 1 }
 0x186   :  { %615 = vsyncpa [#allocation9], 1 }
 0x187   :  { %617 = vsyncpa [#allocation9 + $0x1], 1 }

</bundles_post_ra>
